<compile_context>
chip_gen: v7x
topology: tpu7x:2x2x1
jax: 0.10.0
libtpu: 0.0.40
codegen_flags: <defaults>
</compile_context>

<pallas_src>
import functools

import jax
import jax.numpy as jnp
import numpy as np
from jax.experimental import pallas as pl
from jax.experimental.pallas import tpu as pltpu


def _round_up(x, m):
    return ((x + m - 1) // m) * m


def _cdiv(a, b):
    return -(-a // b)


def _tpu_generation_defaults():
    """(tile_n, num_splits, vmem_limit_bytes) tuned per TPU generation."""
    kind = ""
    vmem_bytes = None
    try:
        kind = jax.devices()[0].device_kind.lower()
    except Exception:
        pass
    try:
        vmem_bytes = int(getattr(pltpu.get_tpu_info(), "vmem_capacity_bytes", 0)) or None
    except Exception:
        pass

    small_vmem = ("v7" in kind) or (vmem_bytes is not None
                                    and vmem_bytes <= 80 * 1024 * 1024)
    big_vmem = (not small_vmem) and (
        any(v in kind for v in ("v5", "v6"))
        or (vmem_bytes is not None and vmem_bytes >= 100 * 1024 * 1024))

    if small_vmem:
        # v7x: 64 MiB VMEM per TC, 2 TensorCores -> cap the tile, leave
        # double-buffer headroom, shard the split axis across the cores.
        return 2048, 2, 48 * 1024 * 1024
    if big_vmem:
        # v5e / v6e: 128 MiB VMEM, single TensorCore.
        return 4096, 1, 64 * 1024 * 1024
    # Unknown part: conservative.
    return 2048, 1, 48 * 1024 * 1024


def _gated_aggr_kernel(gidx_ref, x_ref, *refs, n_pre, gated, batch_size,
                       mxu_dtype, aggr_in_f32):
    # refs layout:
    #   pre layers:  w_0, b_0, ..., w_{n_pre-1}, b_{n_pre-1}    (ReLU after each)
    #   last layer:  gated -> w_gate, b_gate, w_val, b_val ; else -> w_last, b_last
    #   graph lin.:  w_graph
    #   then:        out_ref, acc_ref (VMEM scratch)
    acc_ref = refs[-1]
    out_ref = refs[-2]
    params = refs[:-2]

    t = pl.program_id(1)

    @pl.when(t == 0)
    def _init():
        acc_ref[...] = jnp.zeros_like(acc_ref)

    # ---- node MLP: [Linear, ReLU] * n_node_trans minus the trailing ReLU ----
    # MXU operands in mxu_dtype, accumulation + elementwise in f32 (v5e's
    # VPU/EUP have no bf16, so the elementwise chain stays f32 everywhere).
    h = x_ref[...]                                        # (TILE_N, F), mxu_dtype
    p = 0
    for _ in range(n_pre):
        w_ref, b_ref = params[p], params[p + 1]
        p += 2
        h = jnp.dot(h, w_ref[...], preferred_element_type=jnp.float32) + b_ref[...]
        h = jnp.maximum(h, 0.0).astype(mxu_dtype)

    if gated:
        # W_gate / W_val split at trace time -> no lane slicing of activations.
        w_gate_ref, b_gate_ref, w_val_ref, b_val_ref = params[p:p + 4]
        p += 4
        gate = jax.nn.sigmoid(
            jnp.dot(h, w_gate_ref[...], preferred_element_type=jnp.float32)
            + b_gate_ref[...])
        val = (jnp.dot(h, w_val_ref[...], preferred_element_type=jnp.float32)
               + b_val_ref[...])
        h = val * gate                                    # (TILE_N, H), f32
    else:
        w_ref, b_ref = params[p], params[p + 1]
        p += 2
        h = jnp.dot(h, w_ref[...], preferred_element_type=jnp.float32) + b_ref[...]

    w_graph_ref = params[p]

    # ---- tile-local segment sum on the MXU via a (B, TILE_N) one-hot matmul ----
    # graph ids travel as int16 (HBM traffic cut) and are widened in-kernel.
    idx = gidx_ref[...].astype(jnp.int32)                 # (1, TILE_N)
    tile_n = idx.shape[1]
    rows = jax.lax.broadcasted_iota(jnp.int32, (batch_size, tile_n), 0)
    aggr_dtype = jnp.float32 if aggr_in_f32 else mxu_dtype
    onehot = (rows == idx).astype(aggr_dtype)             # padded / oob ids drop out
    acc_ref[...] += jnp.dot(onehot, h.astype(aggr_dtype),
                            preferred_element_type=jnp.float32)

    # ---- per-split graph linear (bias added by the wrapper after the
    #      cross-split combine so it is not double-counted) ----
    @pl.when(t == pl.num_programs(1) - 1)
    def _finalize():
        out_ref[...] = jnp.dot(acc_ref[...], w_graph_ref[...],
                               preferred_element_type=jnp.float32)


def gated_aggr_forward(x, graph_idx, batch_size, lin_params, graph_tran_params,
                       *, n_hidden, gated, tile_n=None, num_splits=None,
                       vmem_limit_bytes=None, mxu_dtype=jnp.bfloat16,
                       aggr_in_f32=True):
    """x: (N, F) f32; graph_idx: (N,) int; returns (batch_size, n_out) f32.

    graph_idx entries >= batch_size are dropped (segment_sum semantics).
    """
    n_nodes, n_feat = x.shape
    n_lin = len(lin_params)
    w_graph, b_graph = graph_tran_params
    n_out = w_graph.shape[1]

    d_tile, d_splits, d_vmem = _tpu_generation_defaults()
    tile_n = int(tile_n) if tile_n is not None else d_tile
    num_splits = int(num_splits) if num_splits is not None else d_splits
    vmem_limit_bytes = int(vmem_limit_bytes) if vmem_limit_bytes is not None else d_vmem
    num_splits = max(1, num_splits)

    # TILE_N must be a multiple of 128 (lane tiling of the (1, TILE_N) idx
    # block); clamp it to the per-split node count so small inputs do not get
    # padded out to a full generation-sized tile.
    per_split = _cdiv(max(n_nodes, 1), num_splits)
    tile_n = max(128, min(tile_n, _round_up(per_split, 128)))
    tile_n = _round_up(tile_n, 128)
    n_tiles = max(1, _cdiv(per_split, tile_n))
    padded_n = num_splits * n_tiles * tile_n
    pad = padded_n - n_nodes

    x_p = jnp.pad(x, ((0, pad), (0, 0))).astype(mxu_dtype)
    # Pad graph ids with an out-of-range id so padded rows vanish in the
    # one-hot; int16 halves the id HBM traffic whenever batch_size < 32k.
    idx_dtype = jnp.int16 if batch_size < (1 << 15) - 1 else jnp.int32
    gidx_p = jnp.pad(graph_idx.astype(idx_dtype), (0, pad),
                     constant_values=batch_size).reshape(1, padded_n)

    # ---- pack parameters (weights in mxu_dtype, biases in f32, lane-dense) ----
    flat, flat_specs = [], []

    def add_param(arr):
        flat.append(arr)
        # Constant index map -> VMEM resident across the whole grid.
        flat_specs.append(pl.BlockSpec(arr.shape, lambda c, t: (0, 0)))

    for w, b in lin_params[:-1]:
        add_param(w.astype(mxu_dtype))
        add_param(b.reshape(1, -1).astype(jnp.float32))
    w_last, b_last = lin_params[-1]
    if gated:
        add_param(w_last[:, :n_hidden].astype(mxu_dtype))
        add_param(b_last[:n_hidden].reshape(1, -1).astype(jnp.float32))
        add_param(w_last[:, n_hidden:].astype(mxu_dtype))
        add_param(b_last[n_hidden:].reshape(1, -1).astype(jnp.float32))
    else:
        add_param(w_last.astype(mxu_dtype))
        add_param(b_last.reshape(1, -1).astype(jnp.float32))
    add_param(w_graph.astype(jnp.float32))   # tiny; keep the final linear in f32

    # ---- cost estimate (helps XLA schedule around the custom call) ----
    dims, in_dim = [], n_feat
    for w, _ in lin_params:
        dims.append((in_dim, w.shape[1]))
        in_dim = w.shape[1]
    flops = (2 * padded_n * sum(a * b for a, b in dims)
             + 2 * padded_n * batch_size * n_hidden
             + 2 * num_splits * batch_size * n_hidden * n_out)
    transcendentals = padded_n * n_hidden if gated else 0
    bytes_accessed = (int(x_p.size) * x_p.dtype.itemsize
                      + int(gidx_p.size) * gidx_p.dtype.itemsize
                      + sum(int(a.size) * a.dtype.itemsize for a in flat)
                      + num_splits * batch_size * n_out * 4)

    kernel = functools.partial(
        _gated_aggr_kernel, n_pre=n_lin - 1, gated=gated,
        batch_size=batch_size, mxu_dtype=mxu_dtype, aggr_in_f32=aggr_in_f32)

    partials = pl.pallas_call(
        kernel,
        out_shape=jax.ShapeDtypeStruct((num_splits, batch_size, n_out), jnp.float32),
        grid_spec=pltpu.PrefetchScalarGridSpec(
            num_scalar_prefetch=0,
            grid=(num_splits, n_tiles),
            in_specs=[pl.BlockSpec((1, tile_n), lambda c, t: (0, c * n_tiles + t)),
                      pl.BlockSpec((tile_n, n_feat),
                                   lambda c, t: (c * n_tiles + t, 0))]
                     + flat_specs,
            out_specs=pl.BlockSpec((None, batch_size, n_out),
                                   lambda c, t: (c, 0, 0)),
            scratch_shapes=[pltpu.VMEM((batch_size, n_hidden), jnp.float32)]),
        compiler_params=pltpu.CompilerParams(
            dimension_semantics=("parallel", "arbitrary"),
            vmem_limit_bytes=vmem_limit_bytes),
        cost_estimate=pl.CostEstimate(flops=flops,
                                      transcendentals=transcendentals,
                                      bytes_accessed=bytes_accessed),
    )(gidx_p, x_p, *flat)

    # Tiny epilogue: combine the per-split (per-core) partials and add the bias.
    return partials.sum(axis=0) + b_graph


def _reference(x, graph_idx, batch_size, lin_params, graph_tran_params,
               *, n_hidden, gated):
    h = x
    n_lin = len(lin_params)
    for i, (w, b) in enumerate(lin_params):
        h = h @ w + b
        if i < n_lin - 1:
            h = jnp.maximum(h, 0.0)
    if gated:
        h = h[:, n_hidden:] * jax.nn.sigmoid(h[:, :n_hidden])
    g = jax.ops.segment_sum(h, graph_idx, num_segments=batch_size)
    wg, bg = graph_tran_params
    return g @ wg + bg


if __name__ == "__main__":
    # Module hyper-parameters (synthetic, deterministic init).
    n_node_trans = 2
    n_hidden = 32
    n_out = 16
    gated = True

    n_nodes = 640
    n_feat = 8
    batch_size = 4

    key = jax.random.PRNGKey(0)
    ks = jax.random.split(key, 2 * n_node_trans + 4)

    lin_out = n_hidden * (2 if gated else 1)
    lin_params = []
    in_dim = n_feat
    for i in range(n_node_trans):
        w = jax.random.normal(ks[2 * i], (in_dim, lin_out), jnp.float32) * 0.1
        b = jax.random.normal(ks[2 * i + 1], (lin_out,), jnp.float32) * 0.1
        lin_params.append((w, b))
        in_dim = lin_out
    wg = jax.random.normal(ks[2 * n_node_trans], (n_hidden, n_out), jnp.float32) * 0.1
    bg = jax.random.normal(ks[2 * n_node_trans + 1], (n_out,), jnp.float32) * 0.1

    x = jax.random.normal(ks[-2], (n_nodes, n_feat), jnp.float32)
    # nodes evenly assigned to graphs 0..batch_size-1 (sorted, like PyG batches)
    graph_idx = jnp.repeat(jnp.arange(batch_size, dtype=jnp.int32),
                           n_nodes // batch_size)

    ref = _reference(x, graph_idx, batch_size, lin_params, (wg, bg),
                     n_hidden=n_hidden, gated=gated)

    # f32 MXU operands, forced multi-tile / multi-split grid: exercises the
    # accumulator init/finalize gating, padding drop-out and split combine.
    out_f32 = gated_aggr_forward(x, graph_idx, batch_size, lin_params, (wg, bg),
                                 n_hidden=n_hidden, gated=gated,
                                 tile_n=128, num_splits=2,
                                 mxu_dtype=jnp.float32)
    out_f32 = jax.block_until_ready(out_f32)
    np.testing.assert_allclose(np.asarray(out_f32), np.asarray(ref),
                               rtol=1e-5, atol=1e-5)

    # Production path: bf16 MXU operands, f32 accumulation / aggregation,
    # generation-aware tile_n / num_splits / vmem_limit chosen automatically.
    out_bf16 = gated_aggr_forward(x, graph_idx, batch_size, lin_params, (wg, bg),
                                  n_hidden=n_hidden, gated=gated,
                                  mxu_dtype=jnp.bfloat16)
    out_bf16 = jax.block_until_ready(out_bf16)
    np.testing.assert_allclose(np.asarray(out_bf16), np.asarray(ref),
                               rtol=5e-2, atol=5e-2)

    print("KERNEL_OK")
</pallas_src>

<mosaic_0001>
module attributes {stable_mosaic.version = 11 : i64} {
  func.func @_gated_aggr_kernel(%arg0: i32, %arg1: i32, %arg2: memref<1x128xi16, #tpu.memory_space<vmem>>, %arg3: memref<128x8xf32, #tpu.memory_space<vmem>>, %arg4: memref<8x64xf32, #tpu.memory_space<vmem>>, %arg5: memref<1x64xf32, #tpu.memory_space<vmem>>, %arg6: memref<64x32xf32, #tpu.memory_space<vmem>>, %arg7: memref<1x32xf32, #tpu.memory_space<vmem>>, %arg8: memref<64x32xf32, #tpu.memory_space<vmem>>, %arg9: memref<1x32xf32, #tpu.memory_space<vmem>>, %arg10: memref<32x16xf32, #tpu.memory_space<vmem>>, %arg11: memref<1x4x16xf32, #tpu.memory_space<vmem>>, %arg12: memref<4x32xf32, #tpu.memory_space<vmem>>) attributes {dimension_semantics = [#tpu.dimension_semantics<parallel>, #tpu.dimension_semantics<arbitrary>], iteration_bounds = array<i64: 2, 3>, scalar_prefetch = 0 : i64, scratch_operands = 1 : i64, tpu.core_type = #tpu.core_type<tc>, window_params = [{transform_indices = @transform_0, window_bounds = array<i64: 1, 128>}, {transform_indices = @transform_1, window_bounds = array<i64: 128, 8>}, {pipeline_mode = #tpu.pipeline_mode<synchronous>, transform_indices = @transform_2, window_bounds = array<i64: 8, 64>}, {pipeline_mode = #tpu.pipeline_mode<synchronous>, transform_indices = @transform_3, window_bounds = array<i64: 1, 64>}, {pipeline_mode = #tpu.pipeline_mode<synchronous>, transform_indices = @transform_4, window_bounds = array<i64: 64, 32>}, {pipeline_mode = #tpu.pipeline_mode<synchronous>, transform_indices = @transform_5, window_bounds = array<i64: 1, 32>}, {pipeline_mode = #tpu.pipeline_mode<synchronous>, transform_indices = @transform_6, window_bounds = array<i64: 64, 32>}, {pipeline_mode = #tpu.pipeline_mode<synchronous>, transform_indices = @transform_7, window_bounds = array<i64: 1, 32>}, {pipeline_mode = #tpu.pipeline_mode<synchronous>, transform_indices = @transform_8, window_bounds = array<i64: 32, 16>}, {transform_indices = @transform_9, window_bounds = array<i64: 1, 4, 16>}]} {
    %c0_i32 = arith.constant 0 : i32
    %0 = arith.cmpi eq, %arg1, %c0_i32 : i32
    %1 = arith.extui %0 : i1 to i32
    %c0_i32_0 = arith.constant 0 : i32
    %2 = arith.cmpi ne, %1, %c0_i32_0 : i32
    scf.if %2 {
      %cst_26 = arith.constant 0.000000e+00 : f32
      %41 = vector.broadcast %cst_26 : f32 to vector<4x32xf32>
      %c0_27 = arith.constant 0 : index
      %c0_28 = arith.constant 0 : index
      %42 = vector.load %arg12[%c0_27, %c0_28] : memref<4x32xf32, #tpu.memory_space<vmem>>, vector<4x32xf32>
      tpu.vector_store %arg12[%c0_27, %c0_28], %41 {strides = array<i32>} : memref<4x32xf32, #tpu.memory_space<vmem>>, vector<4x32xf32>,
    } else {
    }
    %c0 = arith.constant 0 : index
    %c0_1 = arith.constant 0 : index
    %3 = vector.load %arg3[%c0, %c0_1] : memref<128x8xf32, #tpu.memory_space<vmem>>, vector<128x8xf32>
    %c0_2 = arith.constant 0 : index
    %c0_3 = arith.constant 0 : index
    %4 = vector.load %arg4[%c0_2, %c0_3] : memref<8x64xf32, #tpu.memory_space<vmem>>, vector<8x64xf32>
    %cst = arith.constant dense<0.000000e+00> : vector<128x64xf32>
    %5 = tpu.matmul %3, %4, %cst {dimension_numbers = #tpu.dot_dimension_numbers<[1], [0], [0], [1], [0, 0, 1, 1], [], []>} : vector<128x8xf32>, vector<8x64xf32>, vector<128x64xf32> -> vector<128x64xf32>
    %c0_4 = arith.constant 0 : index
    %c0_5 = arith.constant 0 : index
    %6 = vector.load %arg5[%c0_4, %c0_5] : memref<1x64xf32, #tpu.memory_space<vmem>>, vector<1x64xf32>
    %7 = vector.broadcast %6 : vector<1x64xf32> to vector<128x64xf32>
    %8 = arith.addf %5, %7 : vector<128x64xf32>
    %cst_6 = arith.constant 0.000000e+00 : f32
    %9 = vector.broadcast %cst_6 : f32 to vector<128x64xf32>
    %10 = arith.maximumf %8, %9 : vector<128x64xf32>
    %c0_7 = arith.constant 0 : index
    %c0_8 = arith.constant 0 : index
    %11 = vector.load %arg6[%c0_7, %c0_8] : memref<64x32xf32, #tpu.memory_space<vmem>>, vector<64x32xf32>
    %cst_9 = arith.constant dense<0.000000e+00> : vector<128x32xf32>
    %12 = tpu.matmul %10, %11, %cst_9 {dimension_numbers = #tpu.dot_dimension_numbers<[1], [0], [0], [1], [0, 0, 1, 1], [], []>} : vector<128x64xf32>, vector<64x32xf32>, vector<128x32xf32> -> vector<128x32xf32>
    %c0_10 = arith.constant 0 : index
    %c0_11 = arith.constant 0 : index
    %13 = vector.load %arg7[%c0_10, %c0_11] : memref<1x32xf32, #tpu.memory_space<vmem>>, vector<1x32xf32>
    %14 = vector.broadcast %13 : vector<1x32xf32> to vector<128x32xf32>
    %15 = arith.addf %12, %14 : vector<128x32xf32>
    %16 = arith.negf %15 : vector<128x32xf32>
    %17 = math.exp %16 : vector<128x32xf32>
    %cst_12 = arith.constant 1.000000e+00 : f32
    %18 = vector.broadcast %cst_12 : f32 to vector<128x32xf32>
    %19 = arith.addf %18, %17 : vector<128x32xf32>
    %20 = arith.divf %18, %19 : vector<128x32xf32>
    %c0_13 = arith.constant 0 : index
    %c0_14 = arith.constant 0 : index
    %21 = vector.load %arg8[%c0_13, %c0_14] : memref<64x32xf32, #tpu.memory_space<vmem>>, vector<64x32xf32>
    %cst_15 = arith.constant dense<0.000000e+00> : vector<128x32xf32>
    %22 = tpu.matmul %10, %21, %cst_15 {dimension_numbers = #tpu.dot_dimension_numbers<[1], [0], [0], [1], [0, 0, 1, 1], [], []>} : vector<128x64xf32>, vector<64x32xf32>, vector<128x32xf32> -> vector<128x32xf32>
    %c0_16 = arith.constant 0 : index
    %c0_17 = arith.constant 0 : index
    %23 = vector.load %arg9[%c0_16, %c0_17] : memref<1x32xf32, #tpu.memory_space<vmem>>, vector<1x32xf32>
    %24 = vector.broadcast %23 : vector<1x32xf32> to vector<128x32xf32>
    %25 = arith.addf %22, %24 : vector<128x32xf32>
    %26 = arith.mulf %25, %20 : vector<128x32xf32>
    %c0_18 = arith.constant 0 : index
    %c0_19 = arith.constant 0 : index
    %27 = vector.load %arg2[%c0_18, %c0_19] : memref<1x128xi16, #tpu.memory_space<vmem>>, vector<1x128xi16>
    %28 = arith.extsi %27 : vector<1x128xi16> to vector<1x128xi32>
    %29 = tpu.iota {dimensions = array<i32: 0>} : vector<4x128xi32>
    %30 = vector.broadcast %28 : vector<1x128xi32> to vector<4x128xi32>
    %31 = arith.cmpi eq, %29, %30 : vector<4x128xi32>
    %32 = arith.extui %31 : vector<4x128xi1> to vector<4x128xi32>
    %33 = arith.sitofp %32 : vector<4x128xi32> to vector<4x128xf32>
    %c0_20 = arith.constant 0 : index
    %c0_21 = arith.constant 0 : index
    %34 = vector.load %arg12[%c0_20, %c0_21] : memref<4x32xf32, #tpu.memory_space<vmem>>, vector<4x32xf32>
    %cst_22 = arith.constant dense<0.000000e+00> : vector<4x32xf32>
    %35 = tpu.matmul %33, %26, %cst_22 {dimension_numbers = #tpu.dot_dimension_numbers<[1], [0], [0], [1], [0, 0, 1, 1], [], []>} : vector<4x128xf32>, vector<128x32xf32>, vector<4x32xf32> -> vector<4x32xf32>
    %36 = arith.addf %34, %35 : vector<4x32xf32>
    %c0_23 = arith.constant 0 : index
    %c0_24 = arith.constant 0 : index
    %37 = vector.load %arg12[%c0_23, %c0_24] : memref<4x32xf32, #tpu.memory_space<vmem>>, vector<4x32xf32>
    tpu.vector_store %arg12[%c0_23, %c0_24], %36 {strides = array<i32>} : memref<4x32xf32, #tpu.memory_space<vmem>>, vector<4x32xf32>,
    %c2_i32 = arith.constant 2 : i32
    %38 = arith.cmpi eq, %arg1, %c2_i32 : i32
    %39 = arith.extui %38 : i1 to i32
    %c0_i32_25 = arith.constant 0 : i32
    %40 = arith.cmpi ne, %39, %c0_i32_25 : i32
    scf.if %40 {
      %c0_26 = arith.constant 0 : index
      %c0_27 = arith.constant 0 : index
      %41 = vector.load %arg12[%c0_26, %c0_27] : memref<4x32xf32, #tpu.memory_space<vmem>>, vector<4x32xf32>
      %c0_28 = arith.constant 0 : index
      %c0_29 = arith.constant 0 : index
      %42 = vector.load %arg10[%c0_28, %c0_29] : memref<32x16xf32, #tpu.memory_space<vmem>>, vector<32x16xf32>
      %cst_30 = arith.constant dense<0.000000e+00> : vector<4x16xf32>
      %43 = tpu.matmul %41, %42, %cst_30 {dimension_numbers = #tpu.dot_dimension_numbers<[1], [0], [0], [1], [0, 0, 1, 1], [], []>} : vector<4x32xf32>, vector<32x16xf32>, vector<4x16xf32> -> vector<4x16xf32>
      %c0_31 = arith.constant 0 : index
      %c0_32 = arith.constant 0 : index
      %c0_33 = arith.constant 0 : index
      %44 = vector.load %arg11[%c0_31, %c0_32, %c0_33] : memref<1x4x16xf32, #tpu.memory_space<vmem>>, vector<1x4x16xf32>
      %45 = vector.shape_cast %44 : vector<1x4x16xf32> to vector<4x16xf32>
      %46 = vector.shape_cast %43 : vector<4x16xf32> to vector<1x4x16xf32>
      tpu.vector_store %arg11[%c0_31, %c0_32, %c0_33], %46 {strides = array<i32>} : memref<1x4x16xf32, #tpu.memory_space<vmem>>, vector<1x4x16xf32>,
    } else {
    }
    return
  }
  func.func @transform_0(%arg0: i32, %arg1: i32) -> (i32, i32) {
    %c3_i32 = arith.constant 3 : i32
    %0 = arith.muli %arg0, %c3_i32 : i32
    %1 = arith.addi %0, %arg1 : i32
    %c0_i32 = arith.constant 0 : i32
    %c0_i32_0 = arith.constant 0 : i32
    return %c0_i32, %1 : i32, i32
  }
  func.func @transform_1(%arg0: i32, %arg1: i32) -> (i32, i32) {
    %c3_i32 = arith.constant 3 : i32
    %0 = arith.muli %arg0, %c3_i32 : i32
    %1 = arith.addi %0, %arg1 : i32
    %c0_i32 = arith.constant 0 : i32
    %c0_i32_0 = arith.constant 0 : i32
    return %1, %c0_i32 : i32, i32
  }
  func.func @transform_2(%arg0: i32, %arg1: i32) -> (i32, i32) {
    %c0_i32 = arith.constant 0 : i32
    %c0_i32_0 = arith.constant 0 : i32
    %c0_i32_1 = arith.constant 0 : i32
    return %c0_i32, %c0_i32_0 : i32, i32
  }
  func.func @transform_3(%arg0: i32, %arg1: i32) -> (i32, i32) {
    %c0_i32 = arith.constant 0 : i32
    %c0_i32_0 = arith.constant 0 : i32
    %c0_i32_1 = arith.constant 0 : i32
    return %c0_i32, %c0_i32_0 : i32, i32
  }
  func.func @transform_4(%arg0: i32, %arg1: i32) -> (i32, i32) {
    %c0_i32 = arith.constant 0 : i32
    %c0_i32_0 = arith.constant 0 : i32
    %c0_i32_1 = arith.constant 0 : i32
    return %c0_i32, %c0_i32_0 : i32, i32
  }
  func.func @transform_5(%arg0: i32, %arg1: i32) -> (i32, i32) {
    %c0_i32 = arith.constant 0 : i32
    %c0_i32_0 = arith.constant 0 : i32
    %c0_i32_1 = arith.constant 0 : i32
    return %c0_i32, %c0_i32_0 : i32, i32
  }
  func.func @transform_6(%arg0: i32, %arg1: i32) -> (i32, i32) {
    %c0_i32 = arith.constant 0 : i32
    %c0_i32_0 = arith.constant 0 : i32
    %c0_i32_1 = arith.constant 0 : i32
    return %c0_i32, %c0_i32_0 : i32, i32
  }
  func.func @transform_7(%arg0: i32, %arg1: i32) -> (i32, i32) {
    %c0_i32 = arith.constant 0 : i32
    %c0_i32_0 = arith.constant 0 : i32
    %c0_i32_1 = arith.constant 0 : i32
    return %c0_i32, %c0_i32_0 : i32, i32
  }
  func.func @transform_8(%arg0: i32, %arg1: i32) -> (i32, i32) {
    %c0_i32 = arith.constant 0 : i32
    %c0_i32_0 = arith.constant 0 : i32
    %c0_i32_1 = arith.constant 0 : i32
    return %c0_i32, %c0_i32_0 : i32, i32
  }
  func.func @transform_9(%arg0: i32, %arg1: i32) -> (i32, i32, i32) {
    %c0_i32 = arith.constant 0 : i32
    %c0_i32_0 = arith.constant 0 : i32
    %c0_i32_1 = arith.constant 0 : i32
    return %arg0, %c0_i32, %c0_i32_0 : i32, i32, i32
  }
}

</mosaic_0001>

<bundles_post_ra>
// kernel: tpu_custom_call.1
= control target key start
LH: loop header
LB: loop body
LE: loop exit
PB: predicated region body
PF: predicated region fallthrough
CT: control target
= control target key end

     0   :  { %14 = vsyncpa [#allocation4], 0  ;;  %s2454_s0 = inlined_call_operand.vmem [shape: s16[1,768], index: 0, kind: input, shape index: {}]   ;;  %s2455_s1 = inlined_call_operand.vmem [shape: f32[768,8], index: 1, kind: input, shape index: {}]   ;;  %s2456_s2 = inlined_call_operand.vmem [shape: f32[8,64], index: 2, kind: input, shape index: {}]   ;;  %s2457_s3 = inlined_call_operand.vmem [shape: f32[1,64], index: 3, kind: input, shape index: {}]   ;;  %s2458_s4 = inlined_call_operand.vmem [shape: f32[64,32], index: 4, kind: input, shape index: {}]   ;;  %s2459_s5 = inlined_call_operand.vmem [shape: f32[1,32], index: 5, kind: input, shape index: {}]   ;;  %s2460_s6 = inlined_call_operand.vmem [shape: f32[64,32], index: 6, kind: input, shape index: {}]   ;;  %s2461_s7 = inlined_call_operand.vmem [shape: f32[1,32], index: 7, kind: input, shape index: {}]   ;;  %s2462_s8 = inlined_call_operand.vmem [shape: f32[32,16], index: 8, kind: input, shape index: {}]   ;;  %s2463_s9 = inlined_call_operand.hbm [shape: f32[2,4,16], index: 9, kind: output, shape index: {}]  }
   0x1   :  { %16 = vsyncpa [#allocation4 + $0x1], 0  ;;  %s2056_s30 = smov 0   ;;  %s2058_s10 = smov 0  }
   0x2   :  { %s2060_s11 = smov 0   ;;  %s2062_s12 = smov 0  }
   0x3   :  { %s2064_s13 = smov 0   ;;  %s2066_s14 = smov 0  }
   0x4   :  { %s2068_s15 = smov 0   ;;  %s2070_s16 = smov 0  }
   0x5 LB: > { %2468 = sst [smem:[#allocation6_spill]] %s1987_s14  ;;  %s1371_s17 = sadd.s32 4294967295, %s1995_s16   ;;  %s1995_s16 = sphi %s2070_s16, %s22_s16   ;;  %s1991_s15 = sphi %s2068_s15, %s2482_s15   ;;  %s1987_s14 = sphi %s2066_s14, %s2481_s14   ;;  %s1983_s13 = sphi %s2064_s13, %s2480_s13   ;;  %s1979_s12 = sphi %s2062_s12, %s2479_s12   ;;  %s1975_s11 = sphi %s2060_s11, %s2485_s11   ;;  %s1971_s10 = sphi %s2058_s10, %s2484_s10   ;;  %s1967_s30 = sphi %s2056_s30, %s2483_s30  }
   0x6   : > { %2469 = sst [smem:[#allocation7_spill]] %s1991_s15  ;;  %s1372_s18 = sadd.s32 4294967294, %s1995_s16  }
   0x7   : > { %s31_s19 = sadd.s32 1, %s1987_s14  ;;  %s34_s20 = sadd.s32 1, %s1991_s15 }
   0x8   : > { %p32_p0 = scmp.ge.s32.totalorder %s31_s19, 3  ;;  %p258_p1 = scmp.ne.s32.totalorder %s1975_s11, %s1971_s10 }
   0x9   : > { %p259_p2 = scmp.eq.s32.totalorder %s1371_s17, 5  ;;  %p264_p4 = scmp.ne.s32.totalorder %s1971_s10, %s1967_s30 }
   0xa   : > { %s2487_s19 = smov (%p32_p0, %s31_s19), 0  ;;  %s2489_s20 = smov (!%p32_p0, %s34_s20), %s1991_s15 }
   0xb   : > { %2470 = sst [smem:[#allocation8_spill]] %s2487_s19  ;;  %p2105_p3 = por %p259_p2, %p258_p1 }
   0xc   : > { %p36_p5 = scmp.ge.s32.totalorder %s2489_s20, 2  ;;  %p265_p6 = scmp.eq.s32.totalorder %s1372_s18, 5 }
   0xd   : > { %p1375_p7 = scmp.ge.s32.totalorder %s1995_s16, 1  ;;  %p327_p8 = scmp.lt.s32.totalorder %s1995_s16, 7 }
   0xe   : > { %s2491_s20 = smov (%p36_p5, %s2489_s20), 0  ;;  %p2115_p9 = por %p265_p6, %p264_p4 }
   0xf   : > { %2472 = sst [smem:[#allocation9_spill]] %s2491_s20  ;;  %p328_p10 = pnand %p1375_p7, %p327_p8 }
  0x10   : > { %s245_s23 = ssub.s32 %s1991_s15, %s2491_s20  ;;  %s248_s24 = sadd.s32 1, %s1975_s11 }
  0x11   : > { %p246_p11 = scmp.eq.s32.totalorder %s245_s23, 0  ;;  %331 = sbr.rel (%p328_p10) target bundleno = 992 (0x3e0), region = 56 }
  0x12   : > { %s2467_s26 = sand.u32 (!%p328_p10), 1, %s1971_s10   ;;  %s370_s27 = smul.u32 (!%p328_p10), 3, %s1983_s13 }
  0x13   : > { %s2123_s25 = scalar_select %p246_p11, %s1975_s11, %s248_s24  }
  0x14   : > { %s2129_s28 = sshll.u32 (!%p328_p10), %s2467_s26, 2  ;;  %s371_s29 = sadd.s32 (!%p328_p10), %s1979_s12, %s370_s27 }
  0x15   : > { %2474 = sst [smem:[#allocation10_spill]] %s2123_s25  ;;  %p372_p12 = scmp.lt.s32.totalorder (!%p328_p10), %s371_s29, 5 }
  0x16   : > { %s1377_s17 = sshll.u32 (!%p328_p10), %s371_s29, 4  ;;  %p1379_p0 = scmp.ne.s32.totalorder (!%p328_p10), %s1979_s12, 0 }
  0x17   : > { %p380_p13 = scmp.lt.s32.totalorder (!%p328_p10), %s1377_s17, 95 }
  0x18   : > { %s2493_s29 = smov (!%p372_p12, %s371_s29), 5  ;;  %390 = sbr.rel (%p1379_p0) target bundleno = 31 (0x1f), region = 60 }
  0x19   : > { %s2495_s17 = smov (!%p380_p13, %s1377_s17), 95  ;;  %s374_s24 = scalar_lea.vmem %s2454_s0, %s2493_s29  ;;  %vm391_vm0 = vcmask (!%p1379_p0), 257024   ;;  %v1997_v0 = vmov (!%p1379_p0), 0.0  }
  0x1a   : > { %s1378_s20 = sshll.u32 %s2495_s17, 3  ;;  %392 = vst.msk [vmem:[#allocation2] sm:$0xf] (!%p1379_p0), %vm391_vm0, %v1997_v0 }
  0x1b   : > { %s2141_s14 = scalar_lea.vmem %s2455_s1, %s1378_s20 }
  0x1f PF: > { %v409_v1 = vld [vmem:[%s2456_s2] sm:$0xff]  ;;  %vm417_vm1 = vcmask 64512   ;;  %v394_v3 = vld [vmem:[%s2141_s14 + $0x8] sm:$0xff]  ;;  %v395_v4 = vld [vmem:[%s2141_s14 + $0x10] sm:$0xff]  ;;  %vm642_vm2 = vcmask 523264   ;;  %vm1999_vm3 = vmmov 0  }
  0x20   : > { %v393_v2 = vld [vmem:[%s2141_s14] sm:$0xff]  ;;  %1542 = vmatprep.subr.mxu0 %v409_v1  ;;  %1756 = vmatprep.subr.mxu1 %v409_v1  ;;  %v402_v6 = vld [vmem:[%s2141_s14 + $0x48] sm:$0xff]  ;;  %v403_v7 = vld [vmem:[%s2141_s14 + $0x50] sm:$0xff]  ;;  %vm1191_vm5 = vcmask 257024   ;;  %p1449_p1 = scmp.ne.s32.totalorder %s1979_s12, 2 }
  0x21   : > { %1544 = vmatprep.mubr.msk.f32.mxu0 %vm417_vm1, %v393_v2  ;;  %1543 = vmatpush3.msra.mxu0 %v409_v1  ;;  %v401_v5 = vld [vmem:[%s2141_s14 + $0x40] sm:$0xff]  ;;  %v396_v8 = vld [vmem:[%s2141_s14 + $0x18] sm:$0xff]  ;;  %v628_v13 = vld [vmem:[%s2458_s4 + $0x8] sm:$0xff]  ;;  %vm2003_vm6 = vmmov (!%p1449_p1), 0   ;;  %vm1202_vm7 = vcmask (!%p1449_p1), 261120   ;;  %vm1276_vm8 = vcmask (!%p1449_p1), 125952  }
  0x22   : > { %1545 = vmatmul.mubr.msk.f32.vlgmr.msra.gmra.mrb[0].mxu0 %vm417_vm1, %v394_v3  ;;  %1757 = vmatpush3.msra.mxu1 %v409_v1  ;;  %v397_v9 = vld [vmem:[%s2141_s14 + $0x20] sm:$0xff]  ;;  %v404_v10 = vld [vmem:[%s2141_s14 + $0x58] sm:$0xff]  ;;  %v933_v15 = vld [vmem:[%s2460_s6 + $0x8] sm:$0xff]  ;;  %s2475_s12 = scalar_lea.vmem (!%p1449_p1), [#allocation3], %s2129_s28 }
  0x23   : > { %1547 = vmatprep.mubr.msk.f32.mxu0 %vm417_vm1, %v395_v4  ;;  %1556 = vmatprep.mubr.msk.f32.mxu1 %vm417_vm1, %v401_v5  ;;  %v405_v11 = vld [vmem:[%s2141_s14 + $0x60] sm:$0xff]  ;;  %v629_v18 = vld [vmem:[%s2458_s4 + $0x10] sm:$0xff]  ;;  %v630_v19 = vld [vmem:[%s2458_s4 + $0x18] sm:$0xff] }
  0x24   : > { %1557 = vmatmul.mubr.msk.f32.vlgmr.msra.gmra.mrb[0].mxu1 %vm417_vm1, %v402_v6  ;;  %v627_v12 = vld [vmem:[%s2458_s4] sm:$0xff]  ;;  %v934_v20 = vld [vmem:[%s2460_s6 + $0x10] sm:$0xff]  ;;  %v398_v21 = vld [vmem:[%s2141_s14 + $0x28] sm:$0xff]  ;;  %v1698_v24 = vpack.c.bf16 %v630_v19, %v629_v18 }
  0x25   : > { %1559 = vmatprep.mubr.msk.f32.mxu1 %vm417_vm1, %v403_v7  ;;  %v932_v14 = vld [vmem:[%s2460_s6] sm:$0xff]  ;;  %v1694_v16 = vpack.c.bf16 %v628_v13, %v627_v12  ;;  %v935_v22 = vld [vmem:[%s2460_s6 + $0x18] sm:$0xff]  ;;  %v399_v23 = vld [vmem:[%s2141_s14 + $0x30] sm:$0xff] }
  0x26   : > { %1548 = vmatmul.mubr.msk.f32.gmra.mrb[2].mxu0 %vm417_vm1, %v396_v8  ;;  %v1710_v17 = vpack.c.bf16 %v933_v15, %v932_v14  ;;  %v631_v25 = vld [vmem:[%s2458_s4 + $0x20] sm:$0xff]  ;;  %v632_v26 = vld [vmem:[%s2458_s4 + $0x28] sm:$0xff]  ;;  %v1714_v28 = vpack.c.bf16 %v935_v22, %v934_v20  ;;  %v407_v31 = vld [vmem:[%s2141_s14 + $0x70] sm:$0xff] }
  0x27   : > { %1550 = vmatprep.mubr.msk.f32.mxu0 %vm417_vm1, %v397_v9  ;;  %1695 = vmatprep.subr.bf16.mxu1 %v1694_v16  ;;  %v406_v27 = vld [vmem:[%s2141_s14 + $0x68] sm:$0xff]  ;;  %v936_v29 = vld [vmem:[%s2460_s6 + $0x20] sm:$0xff]  ;;  %v400_v32 = vld [vmem:[%s2141_s14 + $0x38] sm:$0xff]  ;;  %v1702_v33 = vpack.c.bf16 %v632_v26, %v631_v25 }
  0x28   : > { %1560 = vmatmul.mubr.msk.f32.gmra.mrb[2].mxu1 %vm417_vm1, %v404_v10  ;;  %1711 = vmatprep.subr.bf16.mxu0 %v1710_v17  ;;  %v937_v30 = vld [vmem:[%s2460_s6 + $0x28] sm:$0xff]  ;;  %v408_v35 = vld [vmem:[%s2141_s14 + $0x78] sm:$0xff]  ;;  %v633_v36 = vld [vmem:[%s2458_s4 + $0x30] sm:$0xff] }
  0x29   : > { %1562 = vmatprep.mubr.msk.f32.mxu1 %vm417_vm1, %v405_v11  ;;  %1697 = vmatpush3.bf16.msra.mxu1 %v1694_v16  ;;  %v1718_v34 = vpack.c.bf16 %v937_v30, %v936_v29  ;;  %v634_v37 = vld [vmem:[%s2458_s4 + $0x38] sm:$0xff]  ;;  %v938_v39 = vld [vmem:[%s2460_s6 + $0x30] sm:$0xff]  ;;  %v2231_v42 = vld [vmem:[%s2457_s3] ss:$0 sm:$0xff] }
  0x2a   : > { %1551 = vmatmul.mubr.msk.f32.gmra.mrb[4].mxu0 %vm417_vm1, %v398_v21  ;;  %1699 = vmatprep.subr.bf16.mxu1 %v1698_v24  ;;  %v1706_v38 = vpack.c.bf16 %v634_v37, %v633_v36  ;;  %v939_v40 = vld [vmem:[%s2460_s6 + $0x38] sm:$0xff]  ;;  %v2285_v29 = vld [vmem:[%s2459_s5] ss:$0 sm:$0xff] }
  0x2b   : > { %1553 = vmatprep.mubr.msk.f32.mxu0 %vm417_vm1, %v399_v23  ;;  %1713 = vmatpush3.bf16.msra.mxu0 %v1710_v17  ;;  %v1722_v41 = vpack.c.bf16 %v939_v40, %v938_v39 }
  0x2c   : > { %1563 = vmatmul.mubr.msk.f32.gmra.mrb[4].mxu1 %vm417_vm1, %v406_v27  ;;  %1715 = vmatprep.subr.bf16.mxu0 %v1714_v28  ;;  %v1998_v27 = vmov 0.0|0.0  }
  0x2d   : > { %1565 = vmatprep.mubr.msk.f32.mxu1 %vm417_vm1, %v407_v31  ;;  %1701 = vmatpush3.bf16.msra.mxu1 %v1698_v24 }
  0x2e   : > { %1554 = vmatmul.mubr.msk.f32.gmra.mrb[6].mxu0 %vm417_vm1, %v400_v32  ;;  %1703 = vmatprep.subr.bf16.mxu1 %v1702_v33 }
  0x2f   : > { %1717 = vmatpush3.bf16.msra.mxu0 %v1714_v28  ;;  %v2000_v28 = vmov 0.0  }
  0x30   : > { %1566 = vmatmul.mubr.msk.f32.gmra.mrb[6].mxu1 %vm417_vm1, %v408_v35  ;;  %1719 = vmatprep.subr.bf16.mxu0 %v1718_v34 }
  0x31   : > { %1705 = vmatpush3.bf16.msra.mxu1 %v1702_v33 }
  0x32   : > { %1707 = vmatprep.subr.bf16.mxu1 %v1706_v38 }
  0x33   : > { %1721 = vmatpush3.bf16.msra.mxu0 %v1718_v34 }
  0x34   : > { %1723 = vmatprep.subr.bf16.mxu0 %v1722_v41 }
  0x35   : > { %1709 = vmatpush3.bf16.msra.mxu1 %v1706_v38 }
  0x36   : > { %1726 = vmatprep.subr.bf16.mxu1 %v1998_v27 }
  0x37   : > { %1725 = vmatpush3.bf16.msra.mxu0 %v1722_v41 }
  0xf5   : > { %v1546_v43 = vpop.f32.mrb[0].mxu0 }
  0xf6   : > { %v538_v44 = vadd.f32 %v1546_v43, %v2231_v42  ;;  %v532_v45 = vpop.f32.mrb[1].mxu0 }
  0xf7   : > { %v533_v46 = vadd.f32 %v2231_v42, %v532_v45  ;;  %v1558_v47 = vpop.f32.mrb[0].mxu1 }
  0xf8   : > { %v572_v48 = vpop.f32.mrb[1].mxu1  ;;  %v612_v51 = vmax.f32 %v538_v44, 0.0  ;;  %v578_v14 = vadd.f32 %v1558_v47, %v2231_v42 }
  0xf9   : > { %v611_v49 = vmax.f32 %v533_v46, 0.0  ;;  %v1549_v50 = vpop.f32.mrb[2].mxu0  ;;  %v573_v3 = vadd.f32 %v2231_v42, %v572_v48 }
  0xfa   : > { %v548_v52 = vadd.f32 %v1549_v50, %v2231_v42  ;;  %v542_v53 = vpop.f32.mrb[3].mxu0  ;;  %v620_v17 = vmax.f32 %v578_v14, 0.0 }
  0xfb   : > { %v543_v54 = vadd.f32 %v2231_v42, %v542_v53  ;;  %1584 = vmatprep.mubr.msk.f32.mxu1 %vm642_vm2, %v611_v49  ;;  %1624 = vmatprep.mubr.msk.f32.mxu0 %vm642_vm2, %v611_v49  ;;  %v1561_v55 = vpop.f32.mrb[2].mxu1  ;;  %v619_v11 = vmax.f32 %v573_v3, 0.0 }
  0xfc   : > { %1585 = vmatmul.mubr.msk.f32.vlgmr.msra.gmra.mrb[8].mxu1 %vm642_vm2, %v612_v51  ;;  %1625 = vmatmul.mubr.msk.f32.vlgmr.msra.gmra.mrb[8].mxu0 %vm642_vm2, %v612_v51  ;;  %v582_v56 = vpop.f32.mrb[3].mxu1  ;;  %v614_v59 = vmax.f32 %v548_v52, 0.0  ;;  %v588_v18 = vadd.f32 %v1561_v55, %v2231_v42 }
  0xfd   : > { %v613_v57 = vmax.f32 %v543_v54, 0.0  ;;  %v1552_v58 = vpop.f32.mrb[4].mxu0  ;;  %v583_v12 = vadd.f32 %v2231_v42, %v582_v56 }
  0xfe   : > { %v558_v60 = vadd.f32 %v1552_v58, %v2231_v42  ;;  %v552_v61 = vpop.f32.mrb[5].mxu0  ;;  %v622_v21 = vmax.f32 %v588_v18, 0.0 }
  0xff   : > { %v553_v62 = vadd.f32 %v2231_v42, %v552_v61  ;;  %1587 = vmatprep.mubr.msk.f32.mxu1 %vm642_vm2, %v613_v57  ;;  %1627 = vmatprep.mubr.msk.f32.mxu0 %vm642_vm2, %v613_v57  ;;  %v1564_v63 = vpop.f32.mrb[4].mxu1  ;;  %v621_v15 = vmax.f32 %v583_v12, 0.0 }
 0x100   : > { %1588 = vmatmul.mubr.msk.f32.gmra.mrb[10].mxu1 %vm642_vm2, %v614_v59  ;;  %1628 = vmatmul.mubr.msk.f32.gmra.mrb[10].mxu0 %vm642_vm2, %v614_v59  ;;  %v592_v0 = vpop.f32.mrb[5].mxu1  ;;  %v616_v4 = vmax.f32 %v558_v60, 0.0  ;;  %v598_v22 = vadd.f32 %v1564_v63, %v2231_v42 }
 0x101   : > { %v615_v1 = vmax.f32 %v553_v62, 0.0  ;;  %v1555_v2 = vpop.f32.mrb[6].mxu0  ;;  %v593_v16 = vadd.f32 %v2231_v42, %v592_v0 }
 0x102   : > { %v568_v5 = vadd.f32 %v1555_v2, %v2231_v42  ;;  %v562_v6 = vpop.f32.mrb[7].mxu0  ;;  %v624_v24 = vmax.f32 %v598_v22, 0.0 }
 0x103   : > { %v563_v7 = vadd.f32 %v2231_v42, %v562_v6  ;;  %1590 = vmatprep.mubr.msk.f32.mxu1 %vm642_vm2, %v615_v1  ;;  %1630 = vmatprep.mubr.msk.f32.mxu0 %vm642_vm2, %v615_v1  ;;  %v1567_v8 = vpop.f32.mrb[6].mxu1  ;;  %v623_v19 = vmax.f32 %v593_v16, 0.0 }
 0x104   : > { %1591 = vmatmul.mubr.msk.f32.gmra.mrb[12].mxu1 %vm642_vm2, %v616_v4  ;;  %1631 = vmatmul.mubr.msk.f32.gmra.mrb[12].mxu0 %vm642_vm2, %v616_v4  ;;  %v602_v9 = vpop.f32.mrb[7].mxu1  ;;  %v618_v13 = vmax.f32 %v568_v5, 0.0  ;;  %v608_v25 = vadd.f32 %v1567_v8, %v2231_v42 }
 0x105   : > { %v617_v10 = vmax.f32 %v563_v7, 0.0  ;;  %v603_v20 = vadd.f32 %v2231_v42, %v602_v9 }
 0x106   : > { %v626_v26 = vmax.f32 %v608_v25, 0.0 }
 0x107   : > { %1593 = vmatprep.mubr.msk.f32.mxu1 %vm642_vm2, %v617_v10  ;;  %1633 = vmatprep.mubr.msk.f32.mxu0 %vm642_vm2, %v617_v10  ;;  %v625_v23 = vmax.f32 %v603_v20, 0.0 }
 0x108   : > { %1594 = vmatmul.mubr.msk.f32.gmra.mrb[14].mxu1 %vm642_vm2, %v618_v13  ;;  %1634 = vmatmul.mubr.msk.f32.gmra.mrb[14].mxu0 %vm642_vm2, %v618_v13 }
 0x109   : > { %1596 = vmatprep.mubr.msk.f32.mxu1 %vm642_vm2, %v619_v11  ;;  %1636 = vmatprep.mubr.msk.f32.mxu0 %vm642_vm2, %v619_v11 }
 0x10c   : > { %1597 = vmatmul.mubr.msk.f32.gmra.mrb[16].mxu1 %vm642_vm2, %v620_v17  ;;  %1637 = vmatmul.mubr.msk.f32.gmra.mrb[16].mxu0 %vm642_vm2, %v620_v17 }
 0x10d   : > { %1599 = vmatprep.mubr.msk.f32.mxu1 %vm642_vm2, %v621_v15  ;;  %1639 = vmatprep.mubr.msk.f32.mxu0 %vm642_vm2, %v621_v15 }
 0x110   : > { %1600 = vmatmul.mubr.msk.f32.gmra.mrb[18].mxu1 %vm642_vm2, %v622_v21  ;;  %1640 = vmatmul.mubr.msk.f32.gmra.mrb[18].mxu0 %vm642_vm2, %v622_v21  ;;  %v2326_v21 = vld [vmem:[%s2461_s7] ss:$0 sm:$0xff] }
 0x111   : > { %1602 = vmatprep.mubr.msk.f32.mxu1 %vm642_vm2, %v623_v19  ;;  %1642 = vmatprep.mubr.msk.f32.mxu0 %vm642_vm2, %v623_v19 }
 0x114   : > { %1603 = vmatmul.mubr.msk.f32.gmra.mrb[20].mxu1 %vm642_vm2, %v624_v24  ;;  %1643 = vmatmul.mubr.msk.f32.gmra.mrb[20].mxu0 %vm642_vm2, %v624_v24 }
 0x115   : > { %1605 = vmatprep.mubr.msk.f32.mxu1 %vm642_vm2, %v625_v23  ;;  %1645 = vmatprep.mubr.msk.f32.mxu0 %vm642_vm2, %v625_v23 }
 0x118   : > { %1606 = vmatmul.mubr.msk.f32.gmra.mrb[22].mxu1 %vm642_vm2, %v626_v26  ;;  %1646 = vmatmul.mubr.msk.f32.gmra.mrb[22].mxu0 %vm642_vm2, %v626_v26 }
 0x119   : > { %1680 = vmatprep.mubr.msk.f32.mxu1 %vm1999_vm3, %v2000_v28 }
 0x1cf   : > { %v1586_v30 = vpop.f32.mrb[8].mxu1  ;;  %v2287_v31 = vpop.f32.mrb[8].mxu0 }
 0x1d0   : > { %v763_v32 = vadd.f32 %v1586_v30, %v2285_v29  ;;  %v757_v33 = vpop.f32.mrb[9].mxu1  ;;  %v2290_v34 = vpop.f32.mrb[9].mxu0 }
 0x1d1   : > { %v758_v35 = vadd.f32 %v2285_v29, %v757_v33 }
 0x1d2   : > { %v1415_v36 = vmul.f32 -1.442695, %v763_v32 }
 0x1d3   : > { %v1414_v37 = vmul.f32 -1.442695, %v758_v35  ;;  %v1589_v38 = vpop.f32.mrb[10].mxu1  ;;  %v2293_v39 = vpop.f32.mrb[10].mxu0 }
 0x1d4   : > { %1837 = vpow2.f32 %v1415_v36  ;;  %v773_v40 = vadd.f32 %v1589_v38, %v2285_v29  ;;  %v767_v41 = vpop.f32.mrb[11].mxu1  ;;  %v2296_v42 = vpop.f32.mrb[11].mxu0  ;;  %v1019_v38 = vadd.f32 %v2287_v31, %v2326_v21 }
 0x1d5   : > { %1839 = vpow2.f32 %v1414_v37  ;;  %v768_v43 = vadd.f32 %v2285_v29, %v767_v41 }
 0x1d6   : > { %v1417_v44 = vmul.f32 -1.442695, %v773_v40 }
 0x1d7   : > { %v1416_v45 = vmul.f32 -1.442695, %v768_v43  ;;  %v1592_v46 = vpop.f32.mrb[12].mxu1  ;;  %v2299_v47 = vpop.f32.mrb[12].mxu0  ;;  %v1014_v43 = vadd.f32 %v2326_v21, %v2290_v34 }
 0x1d8   : > { %1841 = vpow2.f32 %v1417_v44  ;;  %v783_v48 = vadd.f32 %v1592_v46, %v2285_v29  ;;  %v777_v49 = vpop.f32.mrb[13].mxu1  ;;  %v2302_v50 = vpop.f32.mrb[13].mxu0 }
 0x1d9   : > { %1843 = vpow2.f32 %v1416_v45  ;;  %v778_v51 = vadd.f32 %v2285_v29, %v777_v49 }
 0x1da   : > { %v1419_v52 = vmul.f32 -1.442695, %v783_v48 }
 0x1db   : > { %v1418_v53 = vmul.f32 -1.442695, %v778_v51  ;;  %v1595_v54 = vpop.f32.mrb[14].mxu1  ;;  %v2305_v55 = vpop.f32.mrb[14].mxu0 }
 0x1dc   : > { %1845 = vpow2.f32 %v1419_v52  ;;  %v793_v56 = vadd.f32 %v1595_v54, %v2285_v29  ;;  %v787_v57 = vpop.f32.mrb[15].mxu1  ;;  %v2308_v58 = vpop.f32.mrb[15].mxu0 }
 0x1dd   : > { %1847 = vpow2.f32 %v1418_v53  ;;  %v788_v59 = vadd.f32 %v2285_v29, %v787_v57 }
 0x1de   : > { %v1838_v60 = vpop.eup %1837  ;;  %v1421_v61 = vmul.f32 -1.442695, %v793_v56 }
 0x1df   : > { %v1840_v62 = vpop.eup %1839  ;;  %v885_v63 = vadd.f32 1.0, %v1838_v60  ;;  %v1420_v0 = vmul.f32 -1.442695, %v788_v59  ;;  %v1598_v1 = vpop.f32.mrb[16].mxu1  ;;  %v1029_v59 = vadd.f32 %v2293_v39, %v2326_v21  ;;  %v1039_v39 = vadd.f32 %v2299_v47, %v2326_v21 }
 0x1e0   : > { %v2311_v2 = vpop.f32.mrb[16].mxu0  ;;  %v884_v3 = vadd.f32 1.0, %v1840_v62  ;;  %1849 = vpow2.f32 %v1421_v61  ;;  %v803_v4 = vadd.f32 %v1598_v1, %v2285_v29  ;;  %v797_v5 = vpop.f32.mrb[17].mxu1  ;;  %v1049_v47 = vadd.f32 %v2305_v55, %v2326_v21 }
 0x1e1   : > { %v2314_v6 = vpop.f32.mrb[17].mxu0  ;;  %1851 = vrcp.f32 %v885_v63  ;;  %v798_v7 = vadd.f32 %v2285_v29, %v797_v5 }
 0x1e2   : > { %v1842_v8 = vpop.eup %1841  ;;  %1853 = vrcp.f32 %v884_v3  ;;  %v1423_v9 = vmul.f32 -1.442695, %v803_v4 }
 0x1e3   : > { %v1844_v10 = vpop.eup %1843  ;;  %v887_v11 = vadd.f32 1.0, %v1842_v8  ;;  %1855 = vpow2.f32 %v1420_v0  ;;  %v1422_v12 = vmul.f32 -1.442695, %v798_v7  ;;  %v1601_v13 = vpop.f32.mrb[18].mxu1  ;;  %v1024_v0 = vadd.f32 %v2326_v21, %v2296_v42 }
 0x1e4   : > { %v2317_v14 = vpop.f32.mrb[18].mxu0  ;;  %v886_v15 = vadd.f32 1.0, %v1844_v10  ;;  %1857 = vpow2.f32 %v1423_v9  ;;  %v813_v16 = vadd.f32 %v1601_v13, %v2285_v29  ;;  %v807_v17 = vpop.f32.mrb[19].mxu1  ;;  %v1034_v42 = vadd.f32 %v2326_v21, %v2302_v50 }
 0x1e5   : > { %v2320_v18 = vpop.f32.mrb[19].mxu0  ;;  %1859 = vrcp.f32 %v887_v11  ;;  %v808_v19 = vadd.f32 %v2285_v29, %v807_v17 }
 0x1e6   : > { %v1846_v20 = vpop.eup %1845  ;;  %1861 = vrcp.f32 %v886_v15  ;;  %v1425_v22 = vmul.f32 -1.442695, %v813_v16 }
 0x1e7   : > { %v1848_v23 = vpop.eup %1847  ;;  %v889_v24 = vadd.f32 1.0, %v1846_v20  ;;  %1863 = vpow2.f32 %v1422_v12  ;;  %v1424_v25 = vmul.f32 -1.442695, %v808_v19  ;;  %v1604_v26 = vpop.f32.mrb[20].mxu1 }
 0x1e8   : > { %v2328_v28 = vpop.f32.mrb[20].mxu0  ;;  %v888_v30 = vadd.f32 1.0, %v1848_v23  ;;  %1865 = vpow2.f32 %v1425_v22  ;;  %v823_v32 = vadd.f32 %v1604_v26, %v2285_v29  ;;  %v817_v33 = vpop.f32.mrb[21].mxu1  ;;  %v1044_v26 = vadd.f32 %v2326_v21, %v2308_v58 }
 0x1e9   : > { %v2331_v35 = vpop.f32.mrb[21].mxu0  ;;  %1867 = vrcp.f32 %v889_v24  ;;  %v818_v36 = vadd.f32 %v2285_v29, %v817_v33  ;;  %v1059_v33 = vadd.f32 %v2311_v2, %v2326_v21 }
 0x1ea   : > { %v1850_v37 = vpop.eup %1849  ;;  %1869 = vrcp.f32 %v888_v30  ;;  %v1427_v40 = vmul.f32 -1.442695, %v823_v32 }
 0x1eb   : > { %v1852_v41 = vpop.eup %1851  ;;  %v891_v44 = vadd.f32 1.0, %v1850_v37  ;;  %1871 = vpow2.f32 %v1424_v25  ;;  %v1426_v45 = vmul.f32 -1.442695, %v818_v36  ;;  %v1607_v46 = vpop.f32.mrb[22].mxu1 }
 0x1ec   : > { %v2338_v48 = vpop.f32.mrb[22].mxu0  ;;  %v1854_v49 = vpop.eup %1853  ;;  %v1093_v51 = vmul.f32 %v1852_v41, %v1019_v38  ;;  %1873 = vpow2.f32 %v1427_v40  ;;  %v833_v52 = vadd.f32 %v1607_v46, %v2285_v29 }
 0x1ed   : > { %v827_v53 = vpop.f32.mrb[23].mxu1  ;;  %v2341_v54 = vpop.f32.mrb[23].mxu0  ;;  %v1092_v56 = vmul.f32 %v1854_v49, %v1014_v43  ;;  %1875 = vrcp.f32 %v891_v44  ;;  %v1054_v43 = vadd.f32 %v2326_v21, %v2314_v6  ;;  %v1064_v6 = vadd.f32 %v2326_v21, %v2320_v18 }
 0x1ee   : > { %v1856_v31 = vpop.eup %1855  ;;  %v828_v57 = vadd.f32 %v2285_v29, %v827_v53  ;;  %1877 = vpow2.f32 %v1426_v45  ;;  %v1429_v61 = vmul.f32 -1.442695, %v833_v52  ;;  %v1069_v45 = vadd.f32 %v2317_v14, %v2326_v21 }
 0x1ef   : > { %v1858_v34 = vpop.eup %1857  ;;  %v890_v60 = vadd.f32 1.0, %v1856_v31  ;;  %v1727_v63 = vpack.c.bf16 %v1093_v51, %v1092_v56  ;;  %v1110_v51 = vlaneseq  ;;  %v1079_v56 = vadd.f32 %v2328_v28, %v2326_v21 }
 0x1f0   : > { %v1860_v62 = vpop.eup %1859  ;;  %v893_v1 = vadd.f32 1.0, %v1858_v34  ;;  %v1428_v3 = vmul.f32 -1.442695, %v828_v57 }
 0x1f1   : > { %v1862_v4 = vpop.eup %1861  ;;  %v1095_v5 = vmul.f32 %v1860_v62, %v1029_v59  ;;  %1879 = vrcp.f32 %v890_v60  ;;  %1728 = vmatpush3.bf16.msra.mxu1 %v1727_v63  ;;  %v1111_v34 = vshrl.u32 %v1110_v51, 7  ;;  %v1074_v60 = vadd.f32 %v2326_v21, %v2331_v35 }
 0x1f2   : > { %v1864_v7 = vpop.eup %1863  ;;  %v1094_v8 = vmul.f32 %v1862_v4, %v1024_v0  ;;  %1881 = vrcp.f32 %v893_v1  ;;  %1729 = vmatprep.subr.bf16.mxu1 %v1998_v27  ;;  %v1084_v4 = vadd.f32 %v2326_v21, %v2341_v54  ;;  %v1200_v54 = vld [vmem:[%s2462_s8 + $0x10] sm:$0xff] (!%p1449_p1) }
 0x1f3   : > { %v1866_v29 = vpop.eup %1865  ;;  %v892_v9 = vadd.f32 1.0, %v1864_v7  ;;  %1883 = vpow2.f32 %v1429_v61  ;;  %v1108_v61 = vld [vmem:[%s374_s24] sm:$0x1]  ;;  %v1114_v0 = vsub.s32 0, %v1111_v34 }
 0x1f4   : > { %v1868_v10 = vpop.eup %1867  ;;  %v1730_v11 = vpack.c.bf16 %v1095_v5, %v1094_v8  ;;  %v895_v12 = vadd.f32 1.0, %v1866_v29  ;;  %1885 = vpow2.f32 %v1428_v3  ;;  %v1109_v28 = vunpack.c.l.b16 %v1108_v61 }
 0x1f5   : > { %v1870_v13 = vpop.eup %1869  ;;  %v1097_v15 = vmul.f32 %v1868_v10, %v1039_v39  ;;  %1887 = vrcp.f32 %v892_v9  ;;  %v1089_v3 = vadd.f32 %v2338_v48, %v2326_v21  ;;  %v2001_v9 = vmov 1.0   ;;  %v1119_v10 = vld [vmem:[#allocation2] sm:$0xf] }
 0x1f6   : > { %v1872_v16 = vpop.eup %1871  ;;  %v1096_v17 = vmul.f32 %v1870_v13, %v1034_v42  ;;  %1889 = vrcp.f32 %v895_v12  ;;  %1731 = vmatpush3.bf16.msra.mxu1 %v1730_v11  ;;  %v1115_v29 = vrot.slane %v1109_v28, %v1114_v0  ;;  %v1198_v21 = vld [vmem:[%s2462_s8] sm:$0xff] (!%p1449_p1)  ;;  %v2002_v12 = vmov (!%p1449_p1), 0.0|0.0  }
 0x1f7   : > { %v1874_v19 = vpop.eup %1873  ;;  %v894_v20 = vadd.f32 1.0, %v1872_v16  ;;  %1732 = vmatprep.subr.bf16.mxu1 %v1998_v27  ;;  %1750 = vmatprep.subr.bf16.mxu0 (!%p1449_p1), %v2002_v12  ;;  %v2004_v16 = vmov (!%p1449_p1), 0.0  }
 0x1f8   : > { %v1876_v22 = vpop.eup %1875  ;;  %v1733_v23 = vpack.c.bf16 %v1097_v15, %v1096_v17  ;;  %v897_v24 = vadd.f32 1.0, %v1874_v19  ;;  %vm1116_vm4 = vcmp.eq.s32.totalorder %v1111_v34, %v1115_v29  ;;  %v1201_v15 = vld [vmem:[%s2462_s8 + $0x18] sm:$0xff] (!%p1449_p1)  ;;  %1691 = vmatprep.mubr.msk.f32.mxu0 (!%p1449_p1), %vm2003_vm6, %v2004_v16 }
 0x1f9   : > { %v1878_v50 = vpop.eup %1877  ;;  %v1099_v25 = vmul.f32 %v1876_v22, %v1049_v47  ;;  %1891 = vrcp.f32 %v894_v20  ;;  %v1754_v17 = vpack.c.bf16 (!%p1449_p1), %v1201_v15, %v1200_v54 }
 0x1fa   : > { %1893 = vrcp.f32 %v897_v24  ;;  %v896_v30 = vadd.f32 1.0, %v1878_v50  ;;  %1734 = vmatpush3.bf16.msra.mxu1 %v1733_v23 }
 0x1fb   : > { %v1880_v32 = vpop.eup %1879  ;;  %1735 = vmatprep.subr.bf16.mxu1 %v1998_v27 }
 0x1fc   : > { %v1882_v55 = vpop.eup %1881  ;;  %v1098_v36 = vmul.f32 %v1880_v32, %v1044_v26  ;;  %1895 = vrcp.f32 %v896_v30 }
 0x1fd   : > { %v1884_v37 = vpop.eup %1883  ;;  %v1101_v38 = vmul.f32 %v1882_v55, %v1059_v33 }
 0x1fe   : > { %v1886_v40 = vpop.eup %1885  ;;  %v1736_v41 = vpack.c.bf16 %v1099_v25, %v1098_v36  ;;  %v899_v58 = vadd.f32 1.0, %v1884_v37 }
 0x1ff   : > { %v1888_v44 = vpop.eup %1887  ;;  %v898_v46 = vadd.f32 1.0, %v1886_v40 }
 0x200   : > { %v1890_v49 = vpop.eup %1889  ;;  %v1100_v2 = vmul.f32 %v1888_v44, %v1054_v43  ;;  %1897 = vrcp.f32 %v899_v58  ;;  %1737 = vmatpush3.bf16.msra.mxu1 %v1736_v41 }
 0x201   : > { %v1103_v52 = vmul.f32 %v1890_v49, %v1069_v45  ;;  %1899 = vrcp.f32 %v898_v46  ;;  %1738 = vmatprep.subr.bf16.mxu1 %v1998_v27 }
 0x202   : > { %v1739_v53 = vpack.c.bf16 %v1101_v38, %v1100_v2 }
 0x203   : > { %v1892_v31 = vpop.eup %1891 }
 0x204   : > { %v1894_v14 = vpop.eup %1893  ;;  %v1102_v57 = vmul.f32 %v1892_v31, %v1064_v6  ;;  %1740 = vmatpush3.bf16.msra.mxu1 %v1739_v53 }
 0x205   : > { %v1105_v59 = vmul.f32 %v1894_v14, %v1079_v56  ;;  %1741 = vmatprep.subr.bf16.mxu1 %v1998_v27 }
 0x206   : > { %v1896_v18 = vpop.eup %1895  ;;  %v1742_v62 = vpack.c.bf16 %v1103_v52, %v1102_v57 }
 0x207   : > { %v1104_v63 = vmul.f32 %v1896_v18, %v1074_v60 }
 0x208   : > { %1743 = vmatpush3.bf16.msra.mxu1 %v1742_v62 }
 0x209   : > { %v1745_v1 = vpack.c.bf16 %v1105_v59, %v1104_v63  ;;  %1744 = vmatprep.subr.bf16.mxu1 %v1998_v27 }
 0x20a   : > { %v1898_v35 = vpop.eup %1897 }
 0x20b   : > { %v1900_v5 = vpop.eup %1899  ;;  %v1107_v7 = vmul.f32 %v1898_v35, %v1089_v3 }
 0x20c   : > { %v1106_v8 = vmul.f32 %v1900_v5, %v1084_v4  ;;  %1746 = vmatpush3.bf16.msra.mxu1 %v1745_v1 }
 0x20d   : > { %1747 = vmatprep.subr.bf16.mxu1 %v1998_v27  ;;  %v1199_v27 = vld [vmem:[%s2462_s8 + $0x8] sm:$0xff] (!%p1449_p1) }
 0x20e   : > { %v1748_v39 = vpack.c.bf16 %v1107_v7, %v1106_v8  ;;  %v1751_v13 = vpack.c.bf16 (!%p1449_p1), %v1199_v27, %v1198_v21 }
 0x210   : > { %1749 = vmatpush3.bf16.msra.mxu1 %v1748_v39  ;;  %1752 = vmatpush3.bf16.msra.mxu0 (!%p1449_p1), %v1751_v13 }
 0x211   : > { %1753 = vmatprep.subr.bf16.mxu0 (!%p1449_p1), %v2002_v12 }
 0x213   : > { %1681 = vmatmul.mubr.msk.f32.vlgmr.msra.gmra.mrb[24].mxu1 %vm1116_vm4, %v2001_v9 }
 0x214   : > { %1755 = vmatpush3.bf16.msra.mxu0 (!%p1449_p1), %v1754_v17 }
 0x2e3   : > { %1196 = sbr.rel (%p1449_p1) target bundleno = 966 (0x3c6), region = 64 }
 0x2e6   : > { %v1186_v48 = vpop.f32.mrb[24].mxu1 }
 0x2e7   : > { %v1190_v11 = vadd.f32 %v1186_v48, %v1119_v10  ;;  %v1682_v42 = vpop.f32.mrb[25].mxu1 }
 0x2e9   : > { %1192 = vst.msk [vmem:[#allocation2] sm:$0xf] %vm1191_vm5, %v1190_v11 }
 0x2f0   : > { %v1197_v19 = vld [vmem:[#allocation2] sm:$0xf] }
 0x2f1   : > { %1692 = vmatmul.mubr.msk.f32.vlgmr.msra.gmra.mrb[0].mxu0 %vm1202_vm7, %v1197_v19 }
 0x3c4   : > { %v1272_v47 = vpop.f32.mrb[0].mxu0 }
 0x3c5   : > { %1277 = vst.msk [vmem:[%s2475_s12] sm:$0xf] %vm1276_vm8, %v1272_v47  ;;  %v1693_v20 = vpop.f32.mrb[1].mxu0 }
 0x3c6 PF: > { %s1452_s27 = sshll.u32 %s1983_s13, 6  ;;  %s2476_s29 = scalar_lea.vmem [#allocation3], %s2129_s28 }
 0x3c7   : > { %s2403_s19 = scalar_lea.hbm %s2463_s9, %s1452_s27  ;;  %s1292_s24 = sshll.u32 %s2476_s29, 4  ;;  %s1293_s24 = int_to_ptr.vmem [resolvable:$true] %s1292_s24 }
 0x3c8   : > { %s2477_s20 = sand.u32 1, %s1971_s10   ;;  %s1901_s17 = scalar_lea.vmem %s1293_s24, 64 }
 0x3c9   : > { %s1279_s25 = scalar_lea.sflag [#allocation4], %s2477_s20  ;;  %p1902_p2 = scmp.ne.s32.totalorder %s1293_s24, %s1901_s17 }
 0x3ca   : > { %s2005_s18 = smov [#allocation3]  }
 0x3cb   : > { %p1903_p4 = pnand %p1902_p2, %p2105_p3  ;;  %s1905_s23 = sshll.u32 %s2005_s18, 4  ;;  %s1906_s23 = int_to_ptr.vmem [resolvable:$false] %s1905_s23 }
 0x3cc   : > { %s1907_s26 = scalar_lea.vmem %s1906_s23, 128  ;;  %p1908_p6 = scmp.lt.s32.totalorder %s1293_s24, %s1906_s23 }
 0x3cd   : > { %p1904_p5 = pneg %p1903_p4  ;;  %p1909_p7 = scmp.lt.s32.totalorder %s1907_s26, %s1901_s17 }
 0x3cf   : > { %p1910_p8 = por %p1909_p7, %p1908_p6 }
 0x3d1   : > { %p1911_p10 = pnand %p1910_p8, %p1904_p5 }
 0x3d3   : > { %1914 = shalt.err (!%p1911_p10)
}
 0x3d4   : > { %s1915_s13 = scalar_lea.hbm %s2403_s19, 64  ;;  %s1919_s27 = scalar_lea.hbm %s2463_s9, 128 }
 0x3d5   : > { %p1916_p11 = scmp.ne.s32.totalorder %s2403_s19, %s1915_s13  ;;  %p1920_p0 = scmp.lt.u32.totalorder %s2403_s19, %s2463_s9 }
 0x3d6   : > { %p1921_p1 = scmp.lt.u32.totalorder %s1919_s27, %s1915_s13  ;;  %p1923_p4 = scmp.lt.u32.totalorder %s1915_s13, %s2403_s19 }
 0x3d7   : > { %p1917_p12 = pnand %p1916_p11, %p2105_p3 }
 0x3d8   : > { %p1922_p2 = por %p1921_p1, %p1920_p0 }
 0x3d9   : > { %p1918_p13 = pneg %p1917_p12 }
 0x3da   : > { %p1924_p5 = por %p1923_p4, %p1922_p2 }
 0x3dc   : > { %p1925_p6 = pnand %p1924_p5, %p1918_p13 }
 0x3de   : > { %1928 = shalt.err (!%p1925_p6)
}
 0x3df   : > { %1758 = dma.vmem_to_hbm [thread:$0]  (%p2105_p3), %s1293_s24, 64, %s2403_s19, %s1279_s25  }
 0x3e0 PF: > { %p1764_p7 = scmp.ge.s32.totalorder %s1995_s16, 2  ;;  %s1304_s29 = sand.u32 1, %s1967_s30  }
 0x3e1   : > { %s1305_s20 = scalar_lea.sflag [#allocation4], %s1304_s29 }
 0x3e2   : > { %p1761_p8 = pnand %p1764_p7, %p2115_p9 }
 0x3e4   : > { %1962 = dma.done.wait (!%p1761_p8), %s1305_s20, 64  }
 0x3e5   : > { %1964 = vsyncadd (!%p1761_p8), %s1305_s20, 4294967232  ;;  %s22_s16 = sadd.s32 1, %s1995_s16   ;;  %s2478_s17 = sld [smem:[#allocation10_spill]] }
 0x3e6   : > { %p19_p10 = scmp.ge.s32.totalorder %s22_s16, 8   ;;  %s2479_s12 = sld [smem:[#allocation6_spill]] }
 0x3e7   : > { %s2480_s13 = sld [smem:[#allocation7_spill]]  ;;  %s2481_s14 = sld [smem:[#allocation8_spill]] }
 0x3e8   : > { %s2482_s15 = sld [smem:[#allocation9_spill]]  ;;  %s2483_s30 = smov %s1971_s10 }
 0x3e9   : > { %s2484_s10 = smov %s1975_s11  ;;  %21 = sbr.rel (!%p19_p10) target bundleno = 5 (0x5), region = 102 }
 0x3eb   : > { %s2485_s11 = smov %s2478_s17 }
 0x3f0   :  { %1310 = vsyncpa [#allocation4], 1 }
 0x3f1   :  { %1312 = vsyncpa [#allocation4 + $0x1], 1 }

</bundles_post_ra>
